<compile_context>
chip_gen: v7x
topology: tpu7x:2x2x1
jax: 0.10.0
libtpu: 0.0.40
codegen_flags: <defaults>
</compile_context>

<pallas_src>
import jax
import jax.numpy as jnp
from jax import lax
from jax.experimental import pallas as pl
from jax.experimental.pallas import tpu as pltpu

IN_EPS = 1e-3   # InstanceNorm2d eps (module passes eps=0.001)
BN_EPS = 1e-5   # BatchNorm2d default eps


def _instance_norm(x, eps=IN_EPS):
    """One-pass instance norm of a (C, N) tile over its last axis."""
    inv_n = 1.0 / x.shape[-1]
    mu = jnp.sum(x, axis=-1, keepdims=True) * inv_n
    ex2 = jnp.sum(x * x, axis=-1, keepdims=True) * inv_n
    var = jnp.maximum(ex2 - mu * mu, 0.0)
    return (x - mu) * lax.rsqrt(var + eps)


def oafilter_kernel(x_ref, colp_ref, rowp_ref, rowp2_ref,
                    w1_ref, w2aT_ref, w2bT_ref, w3_ref, o_ref):
    # Packed per-channel (column) params: [s1, t1, b1, s3, t3, b3, 0, 0] -> (C, 8)
    colp = colp_ref[...]
    s1, t1, b1 = colp[:, 0:1], colp[:, 1:2], colp[:, 2:3]
    s3, t3, b3 = colp[:, 3:4], colp[:, 4:5], colp[:, 5:6]
    # Packed per-point (row) params: [s2a, t2a, b2b] -> (3, N)
    rowp = rowp_ref[...]
    s2a, t2a, b2b = rowp[0:1, :], rowp[1:2, :], rowp[2:3, :]
    # Packed bottleneck-dim params: [s2b, t2b] -> (2, P2p)
    rowp2 = rowp2_ref[...]
    s2b, t2b = rowp2[0:1, :], rowp2[1:2, :]

    w1, w2aT = w1_ref[...], w2aT_ref[...]
    w2bT, w3 = w2bT_ref[...], w3_ref[...]

    bb = x_ref.shape[0]                      # static samples-per-block (<= 4)
    for i in range(bb):                      # small static unroll
        x = x_ref[i].astype(jnp.float32)                               # (C, N)

        # ---- conv1: InstanceNorm -> BN -> ReLU -> 1x1 conv (channel mixing)
        h = _instance_norm(x)
        h = jnp.maximum(h * s1 + t1, 0.0)
        h = jnp.dot(w1, h.astype(jnp.bfloat16),
                    preferred_element_type=jnp.float32) + b1           # (O, N)

        # ---- conv2 (point-mixing bottleneck), transpose-free in (O, N) layout:
        #      BN params broadcast along the lane axis; weights pre-transposed.
        a = jnp.maximum(h * s2a + t2a, 0.0)                            # (O, N)
        z = jnp.dot(a.astype(jnp.bfloat16), w2aT,
                    preferred_element_type=jnp.float32)                # (O, P2p); b2a folded into t2b
        z = jnp.maximum(z * s2b + t2b, 0.0)
        z = jnp.dot(z.astype(jnp.bfloat16), w2bT,
                    preferred_element_type=jnp.float32) + b2b          # (O, N)
        t = h + z                                                      # residual inside the block

        # ---- conv3: InstanceNorm -> BN -> ReLU -> 1x1 conv (channel mixing)
        u = _instance_norm(t)
        u = jnp.maximum(u * s3 + t3, 0.0)
        u = jnp.dot(w3, u.astype(jnp.bfloat16),
                    preferred_element_type=jnp.float32) + b3           # (O, N)

        # ---- identity shortcut (out_channels == channels)
        o_ref[i] = (u + x).astype(o_ref.dtype)


def _bn_scale_shift(gamma, beta, rmean, rvar, eps=BN_EPS):
    scale = gamma * lax.rsqrt(rvar + eps)
    shift = beta - scale * rmean
    return scale.astype(jnp.float32), shift.astype(jnp.float32)


def _physical_vmem_bytes():
    try:
        info = pltpu.get_tpu_info()
        v = getattr(info, "vmem_capacity_bytes", None)
        if v:
            return int(v)
    except Exception:
        pass
    return 64 << 20   # conservative fallback (v7x per-TC)


def _pick_block_batch(batch, per_sample_bytes, phys_vmem):
    # Bb=4 on 128 MiB parts (v5e/v6e), Bb<=2 on 64 MiB parts (v7x); shrink
    # further if a block would not comfortably fit the per-TC budget.
    cap = 4 if phys_vmem >= (96 << 20) else 2
    while cap > 1 and cap * per_sample_bytes > phys_vmem // 3:
        cap //= 2
    for bb in range(min(cap, batch), 0, -1):
        if batch % bb == 0:
            return bb
    return 1


def oafilter_bottleneck(x, raw_params, out_dtype=None):
    """x: (B, C, N, 1) NCHW; raw_params: PyTorch-style parameter tuple."""
    (g1, be1, m1, v1, w1, b1,
     g2a, be2a, m2a, v2a, w2a, b2a,
     g2b, be2b, m2b, v2b, w2b, b2b,
     g3, be3, m3, v3, w3, b3) = raw_params

    B, C, N, W = x.shape
    assert W == 1, "OAFilterBottleneck expects NCHW input with W == 1"
    O, Cin = w1.shape
    P2, P1 = w2a.shape
    assert Cin == C and P1 == N, "weight shapes inconsistent with input"
    assert O == C, "identity shortcut requires out_channels == channels"

    out_dtype = jnp.dtype(x.dtype if out_dtype is None else out_dtype)

    # ---- fold eval-mode BatchNorm into scale/shift; fold b2a into bn2b shift
    s1, t1 = _bn_scale_shift(g1, be1, m1, v1)
    s2a, t2a = _bn_scale_shift(g2a, be2a, m2a, v2a)
    s2b, t2b = _bn_scale_shift(g2b, be2b, m2b, v2b)
    t2b = t2b + s2b * b2a
    s3, t3 = _bn_scale_shift(g3, be3, m3, v3)

    # ---- zero-pad bottleneck dim P2 -> multiple of 128 (bit-exact: padded
    #      w2bT rows are zero, so padded columns contribute nothing).
    P2p = ((P2 + 127) // 128) * 128
    pad = P2p - P2
    w2aT = jnp.pad(w2a.T.astype(jnp.bfloat16), ((0, 0), (0, pad)))     # (N, P2p)
    w2bT = jnp.pad(w2b.T.astype(jnp.bfloat16), ((0, pad), (0, 0)))     # (P2p, N)
    s2b_p = jnp.pad(s2b, (0, pad))
    t2b_p = jnp.pad(t2b, (0, pad))

    # ---- pack small per-channel / per-point params into single lane tiles
    colp = jnp.zeros((C, 8), jnp.float32)
    colp = colp.at[:, 0].set(s1).at[:, 1].set(t1).at[:, 2].set(b1.astype(jnp.float32))
    colp = colp.at[:, 3].set(s3).at[:, 4].set(t3).at[:, 5].set(b3.astype(jnp.float32))
    rowp = jnp.stack([s2a, t2a, b2b.astype(jnp.float32)], axis=0)      # (3, N)
    rowp2 = jnp.stack([s2b_p, t2b_p], axis=0)                          # (2, P2p)

    params = (colp, rowp, rowp2,
              w1.astype(jnp.bfloat16), w2aT, w2bT, w3.astype(jnp.bfloat16))

    x3 = x[..., 0]                                                     # (B, C, N)

    # ---- block-batch size and VMEM budget
    phys_vmem = _physical_vmem_bytes()
    per_sample_act = 4 * (C * N + 4 * O * N + 2 * O * P2p)             # f32 live tiles
    per_sample_io = 2 * 2 * (C * N * x.dtype.itemsize + O * N * out_dtype.itemsize)
    per_sample_bytes = per_sample_act + per_sample_io
    Bb = _pick_block_batch(B, per_sample_bytes, phys_vmem)

    param_bytes = sum(int(p.size) * p.dtype.itemsize for p in params)  # single-buffered
    workset = 2 * Bb * per_sample_bytes + param_bytes + (2 << 20)
    clamp = (phys_vmem * 3) // 4                                       # ~48 MiB v7x, ~96 MiB v5e/v6e
    vmem_limit = int(min(max(workset, 16 << 20), clamp))

    # ---- advisory cost estimate for the XLA scheduler
    flops = 2 * B * (O * C * N + 2 * O * N * P2p + O * O * N)
    transcendentals = 2 * B * O
    bytes_accessed = int(x.size * x.dtype.itemsize
                         + B * O * N * out_dtype.itemsize + param_bytes)
    cost = pl.CostEstimate(flops=flops, transcendentals=transcendentals,
                           bytes_accessed=bytes_accessed)

    # Constant-index params: single-buffer (never re-fetched after step 0).
    def full_spec(a):
        return pl.BlockSpec(a.shape, lambda b: (0, 0),
                            pipeline_mode=pl.Buffered(1))

    out3 = pl.pallas_call(
        oafilter_kernel,
        out_shape=jax.ShapeDtypeStruct((B, O, N), out_dtype),
        grid=(B // Bb,),
        in_specs=[pl.BlockSpec((Bb, C, N), lambda b: (b, 0, 0))]
                 + [full_spec(p) for p in params],
        out_specs=pl.BlockSpec((Bb, O, N), lambda b: (b, 0, 0)),
        compiler_params=pltpu.CompilerParams(
            dimension_semantics=("parallel",),
            vmem_limit_bytes=vmem_limit,
        ),
        cost_estimate=cost,
    )(x3, *params)
    return out3[..., None]


# ---------------- pure-JAX reference (PyTorch-layout faithful) ----------------
def _ref_instance_norm(x, eps=IN_EPS):
    mu = jnp.mean(x, axis=1, keepdims=True)
    var = jnp.mean((x - mu) ** 2, axis=1, keepdims=True)
    return (x - mu) * lax.rsqrt(var + eps)


def _ref_sample(xb, raw_params, matmul_bf16):
    (g1, be1, m1, v1, w1, b1,
     g2a, be2a, m2a, v2a, w2a, b2a,
     g2b, be2b, m2b, v2b, w2b, b2b,
     g3, be3, m3, v3, w3, b3) = raw_params

    def bn(x, g, b, m, v):
        return g[:, None] * (x - m[:, None]) * lax.rsqrt(v[:, None] + BN_EPS) + b[:, None]

    def mm(w, x):
        if matmul_bf16:
            w = w.astype(jnp.bfloat16)
            x = x.astype(jnp.bfloat16)
        return jnp.dot(w, x, preferred_element_type=jnp.float32)

    x = xb.astype(jnp.float32)
    h = _ref_instance_norm(x)
    h = jnp.maximum(bn(h, g1, be1, m1, v1), 0.0)
    h = mm(w1, h) + b1[:, None]                 # (O, N)
    t = h.T                                     # (points1, O)
    z = jnp.maximum(bn(t, g2a, be2a, m2a, v2a), 0.0)
    z = mm(w2a, z) + b2a[:, None]               # (points2, O)
    z = jnp.maximum(bn(z, g2b, be2b, m2b, v2b), 0.0)
    z = mm(w2b, z) + b2b[:, None]               # (points1, O)
    t = t + z
    u = _ref_instance_norm(t.T)
    u = jnp.maximum(bn(u, g3, be3, m3, v3), 0.0)
    u = mm(w3, u) + b3[:, None]
    return u + x


if __name__ == "__main__":
    channels = 8
    points1 = 16      # must equal N (the points axis) for conv2 to type-check
    points2 = 8       # bottleneck size
    out_channels = channels
    B, N = 2, points1

    key = jax.random.PRNGKey(0)
    ks = jax.random.split(key, 9)

    x = jax.random.normal(ks[0], (B, channels, N, 1), jnp.float32)

    def bn_raw(k, c):
        k1, k2, k3, k4 = jax.random.split(k, 4)
        gamma = 1.0 + 0.1 * jax.random.normal(k1, (c,), jnp.float32)
        beta = 0.1 * jax.random.normal(k2, (c,), jnp.float32)
        rmean = 0.1 * jax.random.normal(k3, (c,), jnp.float32)
        rvar = jax.random.uniform(k4, (c,), jnp.float32, 0.5, 1.5)
        return gamma, beta, rmean, rvar

    def conv_raw(k, cin, cout):
        k1, k2 = jax.random.split(k)
        w = 0.2 * jax.random.normal(k1, (cout, cin), jnp.float32)
        b = 0.1 * jax.random.normal(k2, (cout,), jnp.float32)
        return w, b

    g1, be1, m1, v1 = bn_raw(ks[1], channels)
    w1, b1 = conv_raw(ks[2], channels, out_channels)
    g2a, be2a, m2a, v2a = bn_raw(ks[3], points1)
    w2a, b2a = conv_raw(ks[4], points1, points2)
    g2b, be2b, m2b, v2b = bn_raw(ks[5], points2)
    w2b, b2b = conv_raw(ks[6], points2, points1)
    g3, be3, m3, v3 = bn_raw(ks[7], out_channels)
    w3, b3 = conv_raw(ks[8], out_channels, out_channels)

    raw_params = (g1, be1, m1, v1, w1, b1,
                  g2a, be2a, m2a, v2a, w2a, b2a,
                  g2b, be2b, m2b, v2b, w2b, b2b,
                  g3, be3, m3, v3, w3, b3)

    out = oafilter_bottleneck(x, raw_params)
    out = jax.block_until_ready(out)
    assert out.shape == (B, out_channels, N, 1)

    # Reference with the same bf16-operand / f32-accumulate matmul policy
    # (validates the transpose-free / BN-folded / P2-padded kernel structure).
    ref_bf16 = jax.vmap(lambda xb: _ref_sample(xb, raw_params, True))(x[..., 0])[..., None]
    assert jnp.allclose(out, ref_bf16, atol=2e-2, rtol=2e-2), "mismatch vs bf16-matmul reference"

    # Full-f32 reference (eval-mode PyTorch semantics); looser tolerance covers
    # the bf16 matmul operands used in the kernel.
    ref_f32 = jax.vmap(lambda xb: _ref_sample(xb, raw_params, False))(x[..., 0])[..., None]
    assert jnp.allclose(out, ref_f32, atol=5e-2, rtol=5e-2), "mismatch vs f32 reference"

    print("KERNEL_OK")
</pallas_src>

<mosaic_0001>
module attributes {stable_mosaic.version = 11 : i64} {
  func.func @oafilter_kernel(%arg0: i32, %arg1: memref<2x8x16xf32, #tpu.memory_space<vmem>>, %arg2: memref<8x8xf32, #tpu.memory_space<vmem>>, %arg3: memref<3x16xf32, #tpu.memory_space<vmem>>, %arg4: memref<2x128xf32, #tpu.memory_space<vmem>>, %arg5: memref<8x8xbf16, #tpu.memory_space<vmem>>, %arg6: memref<16x128xbf16, #tpu.memory_space<vmem>>, %arg7: memref<128x16xbf16, #tpu.memory_space<vmem>>, %arg8: memref<8x8xbf16, #tpu.memory_space<vmem>>, %arg9: memref<2x8x16xf32, #tpu.memory_space<vmem>>) attributes {dimension_semantics = [#tpu.dimension_semantics<parallel>], iteration_bounds = array<i64: 1>, scalar_prefetch = 0 : i64, scratch_operands = 0 : i64, tpu.core_type = #tpu.core_type<tc>, window_params = [{transform_indices = @transform_0, window_bounds = array<i64: 2, 8, 16>}, {pipeline_mode = #tpu.pipeline_mode<synchronous>, transform_indices = @transform_1, window_bounds = array<i64: 8, 8>}, {pipeline_mode = #tpu.pipeline_mode<synchronous>, transform_indices = @transform_2, window_bounds = array<i64: 3, 16>}, {pipeline_mode = #tpu.pipeline_mode<synchronous>, transform_indices = @transform_3, window_bounds = array<i64: 2, 128>}, {pipeline_mode = #tpu.pipeline_mode<synchronous>, transform_indices = @transform_4, window_bounds = array<i64: 8, 8>}, {pipeline_mode = #tpu.pipeline_mode<synchronous>, transform_indices = @transform_5, window_bounds = array<i64: 16, 128>}, {pipeline_mode = #tpu.pipeline_mode<synchronous>, transform_indices = @transform_6, window_bounds = array<i64: 128, 16>}, {pipeline_mode = #tpu.pipeline_mode<synchronous>, transform_indices = @transform_7, window_bounds = array<i64: 8, 8>}, {transform_indices = @transform_8, window_bounds = array<i64: 2, 8, 16>}]} {
    %c0 = arith.constant 0 : index
    %c0_0 = arith.constant 0 : index
    %0 = vector.load %arg2[%c0, %c0_0] : memref<8x8xf32, #tpu.memory_space<vmem>>, vector<8x8xf32>
    %1 = vector.extract_strided_slice %0 {offsets = [0, 0], sizes = [8, 1], strides = [1, 1]} : vector<8x8xf32> to vector<8x1xf32>
    %2 = vector.extract_strided_slice %0 {offsets = [0, 1], sizes = [8, 1], strides = [1, 1]} : vector<8x8xf32> to vector<8x1xf32>
    %3 = vector.extract_strided_slice %0 {offsets = [0, 2], sizes = [8, 1], strides = [1, 1]} : vector<8x8xf32> to vector<8x1xf32>
    %4 = vector.extract_strided_slice %0 {offsets = [0, 3], sizes = [8, 1], strides = [1, 1]} : vector<8x8xf32> to vector<8x1xf32>
    %5 = vector.extract_strided_slice %0 {offsets = [0, 4], sizes = [8, 1], strides = [1, 1]} : vector<8x8xf32> to vector<8x1xf32>
    %6 = vector.extract_strided_slice %0 {offsets = [0, 5], sizes = [8, 1], strides = [1, 1]} : vector<8x8xf32> to vector<8x1xf32>
    %c0_1 = arith.constant 0 : index
    %c0_2 = arith.constant 0 : index
    %7 = vector.load %arg3[%c0_1, %c0_2] : memref<3x16xf32, #tpu.memory_space<vmem>>, vector<3x16xf32>
    %8 = vector.extract_strided_slice %7 {offsets = [0, 0], sizes = [1, 16], strides = [1, 1]} : vector<3x16xf32> to vector<1x16xf32>
    %9 = vector.extract_strided_slice %7 {offsets = [1, 0], sizes = [1, 16], strides = [1, 1]} : vector<3x16xf32> to vector<1x16xf32>
    %10 = vector.extract_strided_slice %7 {offsets = [2, 0], sizes = [1, 16], strides = [1, 1]} : vector<3x16xf32> to vector<1x16xf32>
    %c0_3 = arith.constant 0 : index
    %c0_4 = arith.constant 0 : index
    %11 = vector.load %arg4[%c0_3, %c0_4] : memref<2x128xf32, #tpu.memory_space<vmem>>, vector<2x128xf32>
    %12 = vector.extract_strided_slice %11 {offsets = [0, 0], sizes = [1, 128], strides = [1, 1]} : vector<2x128xf32> to vector<1x128xf32>
    %13 = vector.extract_strided_slice %11 {offsets = [1, 0], sizes = [1, 128], strides = [1, 1]} : vector<2x128xf32> to vector<1x128xf32>
    %c0_5 = arith.constant 0 : index
    %c0_6 = arith.constant 0 : index
    %14 = vector.load %arg5[%c0_5, %c0_6] : memref<8x8xbf16, #tpu.memory_space<vmem>>, vector<8x8xbf16>
    %c0_7 = arith.constant 0 : index
    %c0_8 = arith.constant 0 : index
    %15 = vector.load %arg6[%c0_7, %c0_8] : memref<16x128xbf16, #tpu.memory_space<vmem>>, vector<16x128xbf16>
    %c0_9 = arith.constant 0 : index
    %c0_10 = arith.constant 0 : index
    %16 = vector.load %arg7[%c0_9, %c0_10] : memref<128x16xbf16, #tpu.memory_space<vmem>>, vector<128x16xbf16>
    %c0_11 = arith.constant 0 : index
    %c0_12 = arith.constant 0 : index
    %17 = vector.load %arg8[%c0_11, %c0_12] : memref<8x8xbf16, #tpu.memory_space<vmem>>, vector<8x8xbf16>
    %c0_13 = arith.constant 0 : index
    %c0_14 = arith.constant 0 : index
    %c0_15 = arith.constant 0 : index
    %18 = vector.load %arg1[%c0_13, %c0_14, %c0_15] : memref<2x8x16xf32, #tpu.memory_space<vmem>>, vector<1x8x16xf32>
    %19 = vector.shape_cast %18 : vector<1x8x16xf32> to vector<8x16xf32>
    %cst = arith.constant dense<0.000000e+00> : vector<8xf32>
    %20 = vector.multi_reduction <add>, %19, %cst [1] : vector<8x16xf32> to vector<8xf32>
    %21 = vector.shape_cast %20 : vector<8xf32> to vector<8x1xf32>
    %cst_16 = arith.constant 6.250000e-02 : f32
    %22 = vector.broadcast %cst_16 : f32 to vector<8x1xf32>
    %23 = arith.mulf %21, %22 : vector<8x1xf32>
    %24 = arith.mulf %19, %19 : vector<8x16xf32>
    %cst_17 = arith.constant dense<0.000000e+00> : vector<8xf32>
    %25 = vector.multi_reduction <add>, %24, %cst_17 [1] : vector<8x16xf32> to vector<8xf32>
    %26 = vector.shape_cast %25 : vector<8xf32> to vector<8x1xf32>
    %cst_18 = arith.constant 6.250000e-02 : f32
    %27 = vector.broadcast %cst_18 : f32 to vector<8x1xf32>
    %28 = arith.mulf %26, %27 : vector<8x1xf32>
    %29 = arith.mulf %23, %23 : vector<8x1xf32>
    %30 = arith.subf %28, %29 : vector<8x1xf32>
    %cst_19 = arith.constant 0.000000e+00 : f32
    %31 = vector.broadcast %cst_19 : f32 to vector<8x1xf32>
    %32 = arith.maximumf %30, %31 : vector<8x1xf32>
    %33 = vector.broadcast %23 : vector<8x1xf32> to vector<8x16xf32>
    %34 = arith.subf %19, %33 : vector<8x16xf32>
    %cst_20 = arith.constant 1.000000e-03 : f32
    %35 = vector.broadcast %cst_20 : f32 to vector<8x1xf32>
    %36 = arith.addf %32, %35 : vector<8x1xf32>
    %37 = math.rsqrt %36 : vector<8x1xf32>
    %38 = vector.broadcast %37 : vector<8x1xf32> to vector<8x16xf32>
    %39 = arith.mulf %34, %38 : vector<8x16xf32>
    %40 = vector.broadcast %1 : vector<8x1xf32> to vector<8x16xf32>
    %41 = arith.mulf %39, %40 : vector<8x16xf32>
    %42 = vector.broadcast %2 : vector<8x1xf32> to vector<8x16xf32>
    %43 = arith.addf %41, %42 : vector<8x16xf32>
    %cst_21 = arith.constant 0.000000e+00 : f32
    %44 = vector.broadcast %cst_21 : f32 to vector<8x16xf32>
    %45 = arith.maximumf %43, %44 : vector<8x16xf32>
    %46 = arith.truncf %45 : vector<8x16xf32> to vector<8x16xbf16>
    %cst_22 = arith.constant dense<0.000000e+00> : vector<8x16xf32>
    %47 = tpu.matmul %14, %46, %cst_22 {dimension_numbers = #tpu.dot_dimension_numbers<[1], [0], [0], [1], [0, 0, 1, 1], [], []>} : vector<8x8xbf16>, vector<8x16xbf16>, vector<8x16xf32> -> vector<8x16xf32>
    %48 = vector.broadcast %3 : vector<8x1xf32> to vector<8x16xf32>
    %49 = arith.addf %47, %48 : vector<8x16xf32>
    %50 = vector.broadcast %8 : vector<1x16xf32> to vector<8x16xf32>
    %51 = arith.mulf %49, %50 : vector<8x16xf32>
    %52 = vector.broadcast %9 : vector<1x16xf32> to vector<8x16xf32>
    %53 = arith.addf %51, %52 : vector<8x16xf32>
    %cst_23 = arith.constant 0.000000e+00 : f32
    %54 = vector.broadcast %cst_23 : f32 to vector<8x16xf32>
    %55 = arith.maximumf %53, %54 : vector<8x16xf32>
    %56 = arith.truncf %55 : vector<8x16xf32> to vector<8x16xbf16>
    %cst_24 = arith.constant dense<0.000000e+00> : vector<8x128xf32>
    %57 = tpu.matmul %56, %15, %cst_24 {dimension_numbers = #tpu.dot_dimension_numbers<[1], [0], [0], [1], [0, 0, 1, 1], [], []>} : vector<8x16xbf16>, vector<16x128xbf16>, vector<8x128xf32> -> vector<8x128xf32>
    %58 = vector.broadcast %12 : vector<1x128xf32> to vector<8x128xf32>
    %59 = arith.mulf %57, %58 : vector<8x128xf32>
    %60 = vector.broadcast %13 : vector<1x128xf32> to vector<8x128xf32>
    %61 = arith.addf %59, %60 : vector<8x128xf32>
    %cst_25 = arith.constant 0.000000e+00 : f32
    %62 = vector.broadcast %cst_25 : f32 to vector<8x128xf32>
    %63 = arith.maximumf %61, %62 : vector<8x128xf32>
    %64 = arith.truncf %63 : vector<8x128xf32> to vector<8x128xbf16>
    %cst_26 = arith.constant dense<0.000000e+00> : vector<8x16xf32>
    %65 = tpu.matmul %64, %16, %cst_26 {dimension_numbers = #tpu.dot_dimension_numbers<[1], [0], [0], [1], [0, 0, 1, 1], [], []>} : vector<8x128xbf16>, vector<128x16xbf16>, vector<8x16xf32> -> vector<8x16xf32>
    %66 = vector.broadcast %10 : vector<1x16xf32> to vector<8x16xf32>
    %67 = arith.addf %65, %66 : vector<8x16xf32>
    %68 = arith.addf %49, %67 : vector<8x16xf32>
    %cst_27 = arith.constant dense<0.000000e+00> : vector<8xf32>
    %69 = vector.multi_reduction <add>, %68, %cst_27 [1] : vector<8x16xf32> to vector<8xf32>
    %70 = vector.shape_cast %69 : vector<8xf32> to vector<8x1xf32>
    %cst_28 = arith.constant 6.250000e-02 : f32
    %71 = vector.broadcast %cst_28 : f32 to vector<8x1xf32>
    %72 = arith.mulf %70, %71 : vector<8x1xf32>
    %73 = arith.mulf %68, %68 : vector<8x16xf32>
    %cst_29 = arith.constant dense<0.000000e+00> : vector<8xf32>
    %74 = vector.multi_reduction <add>, %73, %cst_29 [1] : vector<8x16xf32> to vector<8xf32>
    %75 = vector.shape_cast %74 : vector<8xf32> to vector<8x1xf32>
    %cst_30 = arith.constant 6.250000e-02 : f32
    %76 = vector.broadcast %cst_30 : f32 to vector<8x1xf32>
    %77 = arith.mulf %75, %76 : vector<8x1xf32>
    %78 = arith.mulf %72, %72 : vector<8x1xf32>
    %79 = arith.subf %77, %78 : vector<8x1xf32>
    %cst_31 = arith.constant 0.000000e+00 : f32
    %80 = vector.broadcast %cst_31 : f32 to vector<8x1xf32>
    %81 = arith.maximumf %79, %80 : vector<8x1xf32>
    %82 = vector.broadcast %72 : vector<8x1xf32> to vector<8x16xf32>
    %83 = arith.subf %68, %82 : vector<8x16xf32>
    %cst_32 = arith.constant 1.000000e-03 : f32
    %84 = vector.broadcast %cst_32 : f32 to vector<8x1xf32>
    %85 = arith.addf %81, %84 : vector<8x1xf32>
    %86 = math.rsqrt %85 : vector<8x1xf32>
    %87 = vector.broadcast %86 : vector<8x1xf32> to vector<8x16xf32>
    %88 = arith.mulf %83, %87 : vector<8x16xf32>
    %89 = vector.broadcast %4 : vector<8x1xf32> to vector<8x16xf32>
    %90 = arith.mulf %88, %89 : vector<8x16xf32>
    %91 = vector.broadcast %5 : vector<8x1xf32> to vector<8x16xf32>
    %92 = arith.addf %90, %91 : vector<8x16xf32>
    %cst_33 = arith.constant 0.000000e+00 : f32
    %93 = vector.broadcast %cst_33 : f32 to vector<8x16xf32>
    %94 = arith.maximumf %92, %93 : vector<8x16xf32>
    %95 = arith.truncf %94 : vector<8x16xf32> to vector<8x16xbf16>
    %cst_34 = arith.constant dense<0.000000e+00> : vector<8x16xf32>
    %96 = tpu.matmul %17, %95, %cst_34 {dimension_numbers = #tpu.dot_dimension_numbers<[1], [0], [0], [1], [0, 0, 1, 1], [], []>} : vector<8x8xbf16>, vector<8x16xbf16>, vector<8x16xf32> -> vector<8x16xf32>
    %97 = vector.broadcast %6 : vector<8x1xf32> to vector<8x16xf32>
    %98 = arith.addf %96, %97 : vector<8x16xf32>
    %99 = arith.addf %98, %19 : vector<8x16xf32>
    %c0_35 = arith.constant 0 : index
    %c0_36 = arith.constant 0 : index
    %c0_37 = arith.constant 0 : index
    %100 = vector.load %arg9[%c0_35, %c0_36, %c0_37] : memref<2x8x16xf32, #tpu.memory_space<vmem>>, vector<1x8x16xf32>
    %101 = vector.shape_cast %100 : vector<1x8x16xf32> to vector<8x16xf32>
    %102 = vector.shape_cast %99 : vector<8x16xf32> to vector<1x8x16xf32>
    tpu.vector_store %arg9[%c0_35, %c0_36, %c0_37], %102 {strides = array<i32>} : memref<2x8x16xf32, #tpu.memory_space<vmem>>, vector<1x8x16xf32>,
    %c1 = arith.constant 1 : index
    %c0_38 = arith.constant 0 : index
    %c0_39 = arith.constant 0 : index
    %103 = vector.load %arg1[%c1, %c0_38, %c0_39] : memref<2x8x16xf32, #tpu.memory_space<vmem>>, vector<1x8x16xf32>
    %104 = vector.shape_cast %103 : vector<1x8x16xf32> to vector<8x16xf32>
    %cst_40 = arith.constant dense<0.000000e+00> : vector<8xf32>
    %105 = vector.multi_reduction <add>, %104, %cst_40 [1] : vector<8x16xf32> to vector<8xf32>
    %106 = vector.shape_cast %105 : vector<8xf32> to vector<8x1xf32>
    %cst_41 = arith.constant 6.250000e-02 : f32
    %107 = vector.broadcast %cst_41 : f32 to vector<8x1xf32>
    %108 = arith.mulf %106, %107 : vector<8x1xf32>
    %109 = arith.mulf %104, %104 : vector<8x16xf32>
    %cst_42 = arith.constant dense<0.000000e+00> : vector<8xf32>
    %110 = vector.multi_reduction <add>, %109, %cst_42 [1] : vector<8x16xf32> to vector<8xf32>
    %111 = vector.shape_cast %110 : vector<8xf32> to vector<8x1xf32>
    %cst_43 = arith.constant 6.250000e-02 : f32
    %112 = vector.broadcast %cst_43 : f32 to vector<8x1xf32>
    %113 = arith.mulf %111, %112 : vector<8x1xf32>
    %114 = arith.mulf %108, %108 : vector<8x1xf32>
    %115 = arith.subf %113, %114 : vector<8x1xf32>
    %cst_44 = arith.constant 0.000000e+00 : f32
    %116 = vector.broadcast %cst_44 : f32 to vector<8x1xf32>
    %117 = arith.maximumf %115, %116 : vector<8x1xf32>
    %118 = vector.broadcast %108 : vector<8x1xf32> to vector<8x16xf32>
    %119 = arith.subf %104, %118 : vector<8x16xf32>
    %cst_45 = arith.constant 1.000000e-03 : f32
    %120 = vector.broadcast %cst_45 : f32 to vector<8x1xf32>
    %121 = arith.addf %117, %120 : vector<8x1xf32>
    %122 = math.rsqrt %121 : vector<8x1xf32>
    %123 = vector.broadcast %122 : vector<8x1xf32> to vector<8x16xf32>
    %124 = arith.mulf %119, %123 : vector<8x16xf32>
    %125 = vector.broadcast %1 : vector<8x1xf32> to vector<8x16xf32>
    %126 = arith.mulf %124, %125 : vector<8x16xf32>
    %127 = vector.broadcast %2 : vector<8x1xf32> to vector<8x16xf32>
    %128 = arith.addf %126, %127 : vector<8x16xf32>
    %cst_46 = arith.constant 0.000000e+00 : f32
    %129 = vector.broadcast %cst_46 : f32 to vector<8x16xf32>
    %130 = arith.maximumf %128, %129 : vector<8x16xf32>
    %131 = arith.truncf %130 : vector<8x16xf32> to vector<8x16xbf16>
    %cst_47 = arith.constant dense<0.000000e+00> : vector<8x16xf32>
    %132 = tpu.matmul %14, %131, %cst_47 {dimension_numbers = #tpu.dot_dimension_numbers<[1], [0], [0], [1], [0, 0, 1, 1], [], []>} : vector<8x8xbf16>, vector<8x16xbf16>, vector<8x16xf32> -> vector<8x16xf32>
    %133 = vector.broadcast %3 : vector<8x1xf32> to vector<8x16xf32>
    %134 = arith.addf %132, %133 : vector<8x16xf32>
    %135 = vector.broadcast %8 : vector<1x16xf32> to vector<8x16xf32>
    %136 = arith.mulf %134, %135 : vector<8x16xf32>
    %137 = vector.broadcast %9 : vector<1x16xf32> to vector<8x16xf32>
    %138 = arith.addf %136, %137 : vector<8x16xf32>
    %cst_48 = arith.constant 0.000000e+00 : f32
    %139 = vector.broadcast %cst_48 : f32 to vector<8x16xf32>
    %140 = arith.maximumf %138, %139 : vector<8x16xf32>
    %141 = arith.truncf %140 : vector<8x16xf32> to vector<8x16xbf16>
    %cst_49 = arith.constant dense<0.000000e+00> : vector<8x128xf32>
    %142 = tpu.matmul %141, %15, %cst_49 {dimension_numbers = #tpu.dot_dimension_numbers<[1], [0], [0], [1], [0, 0, 1, 1], [], []>} : vector<8x16xbf16>, vector<16x128xbf16>, vector<8x128xf32> -> vector<8x128xf32>
    %143 = vector.broadcast %12 : vector<1x128xf32> to vector<8x128xf32>
    %144 = arith.mulf %142, %143 : vector<8x128xf32>
    %145 = vector.broadcast %13 : vector<1x128xf32> to vector<8x128xf32>
    %146 = arith.addf %144, %145 : vector<8x128xf32>
    %cst_50 = arith.constant 0.000000e+00 : f32
    %147 = vector.broadcast %cst_50 : f32 to vector<8x128xf32>
    %148 = arith.maximumf %146, %147 : vector<8x128xf32>
    %149 = arith.truncf %148 : vector<8x128xf32> to vector<8x128xbf16>
    %cst_51 = arith.constant dense<0.000000e+00> : vector<8x16xf32>
    %150 = tpu.matmul %149, %16, %cst_51 {dimension_numbers = #tpu.dot_dimension_numbers<[1], [0], [0], [1], [0, 0, 1, 1], [], []>} : vector<8x128xbf16>, vector<128x16xbf16>, vector<8x16xf32> -> vector<8x16xf32>
    %151 = vector.broadcast %10 : vector<1x16xf32> to vector<8x16xf32>
    %152 = arith.addf %150, %151 : vector<8x16xf32>
    %153 = arith.addf %134, %152 : vector<8x16xf32>
    %cst_52 = arith.constant dense<0.000000e+00> : vector<8xf32>
    %154 = vector.multi_reduction <add>, %153, %cst_52 [1] : vector<8x16xf32> to vector<8xf32>
    %155 = vector.shape_cast %154 : vector<8xf32> to vector<8x1xf32>
    %cst_53 = arith.constant 6.250000e-02 : f32
    %156 = vector.broadcast %cst_53 : f32 to vector<8x1xf32>
    %157 = arith.mulf %155, %156 : vector<8x1xf32>
    %158 = arith.mulf %153, %153 : vector<8x16xf32>
    %cst_54 = arith.constant dense<0.000000e+00> : vector<8xf32>
    %159 = vector.multi_reduction <add>, %158, %cst_54 [1] : vector<8x16xf32> to vector<8xf32>
    %160 = vector.shape_cast %159 : vector<8xf32> to vector<8x1xf32>
    %cst_55 = arith.constant 6.250000e-02 : f32
    %161 = vector.broadcast %cst_55 : f32 to vector<8x1xf32>
    %162 = arith.mulf %160, %161 : vector<8x1xf32>
    %163 = arith.mulf %157, %157 : vector<8x1xf32>
    %164 = arith.subf %162, %163 : vector<8x1xf32>
    %cst_56 = arith.constant 0.000000e+00 : f32
    %165 = vector.broadcast %cst_56 : f32 to vector<8x1xf32>
    %166 = arith.maximumf %164, %165 : vector<8x1xf32>
    %167 = vector.broadcast %157 : vector<8x1xf32> to vector<8x16xf32>
    %168 = arith.subf %153, %167 : vector<8x16xf32>
    %cst_57 = arith.constant 1.000000e-03 : f32
    %169 = vector.broadcast %cst_57 : f32 to vector<8x1xf32>
    %170 = arith.addf %166, %169 : vector<8x1xf32>
    %171 = math.rsqrt %170 : vector<8x1xf32>
    %172 = vector.broadcast %171 : vector<8x1xf32> to vector<8x16xf32>
    %173 = arith.mulf %168, %172 : vector<8x16xf32>
    %174 = vector.broadcast %4 : vector<8x1xf32> to vector<8x16xf32>
    %175 = arith.mulf %173, %174 : vector<8x16xf32>
    %176 = vector.broadcast %5 : vector<8x1xf32> to vector<8x16xf32>
    %177 = arith.addf %175, %176 : vector<8x16xf32>
    %cst_58 = arith.constant 0.000000e+00 : f32
    %178 = vector.broadcast %cst_58 : f32 to vector<8x16xf32>
    %179 = arith.maximumf %177, %178 : vector<8x16xf32>
    %180 = arith.truncf %179 : vector<8x16xf32> to vector<8x16xbf16>
    %cst_59 = arith.constant dense<0.000000e+00> : vector<8x16xf32>
    %181 = tpu.matmul %17, %180, %cst_59 {dimension_numbers = #tpu.dot_dimension_numbers<[1], [0], [0], [1], [0, 0, 1, 1], [], []>} : vector<8x8xbf16>, vector<8x16xbf16>, vector<8x16xf32> -> vector<8x16xf32>
    %182 = vector.broadcast %6 : vector<8x1xf32> to vector<8x16xf32>
    %183 = arith.addf %181, %182 : vector<8x16xf32>
    %184 = arith.addf %183, %104 : vector<8x16xf32>
    %c1_60 = arith.constant 1 : index
    %c0_61 = arith.constant 0 : index
    %c0_62 = arith.constant 0 : index
    %185 = vector.load %arg9[%c1_60, %c0_61, %c0_62] : memref<2x8x16xf32, #tpu.memory_space<vmem>>, vector<1x8x16xf32>
    %186 = vector.shape_cast %185 : vector<1x8x16xf32> to vector<8x16xf32>
    %187 = vector.shape_cast %184 : vector<8x16xf32> to vector<1x8x16xf32>
    tpu.vector_store %arg9[%c1_60, %c0_61, %c0_62], %187 {strides = array<i32>} : memref<2x8x16xf32, #tpu.memory_space<vmem>>, vector<1x8x16xf32>,
    return
  }
  func.func @transform_0(%arg0: i32) -> (i32, i32, i32) {
    %c0_i32 = arith.constant 0 : i32
    %c0_i32_0 = arith.constant 0 : i32
    %c0_i32_1 = arith.constant 0 : i32
    return %arg0, %c0_i32, %c0_i32_0 : i32, i32, i32
  }
  func.func @transform_1(%arg0: i32) -> (i32, i32) {
    %c0_i32 = arith.constant 0 : i32
    %c0_i32_0 = arith.constant 0 : i32
    %c0_i32_1 = arith.constant 0 : i32
    return %c0_i32, %c0_i32_0 : i32, i32
  }
  func.func @transform_2(%arg0: i32) -> (i32, i32) {
    %c0_i32 = arith.constant 0 : i32
    %c0_i32_0 = arith.constant 0 : i32
    %c0_i32_1 = arith.constant 0 : i32
    return %c0_i32, %c0_i32_0 : i32, i32
  }
  func.func @transform_3(%arg0: i32) -> (i32, i32) {
    %c0_i32 = arith.constant 0 : i32
    %c0_i32_0 = arith.constant 0 : i32
    %c0_i32_1 = arith.constant 0 : i32
    return %c0_i32, %c0_i32_0 : i32, i32
  }
  func.func @transform_4(%arg0: i32) -> (i32, i32) {
    %c0_i32 = arith.constant 0 : i32
    %c0_i32_0 = arith.constant 0 : i32
    %c0_i32_1 = arith.constant 0 : i32
    return %c0_i32, %c0_i32_0 : i32, i32
  }
  func.func @transform_5(%arg0: i32) -> (i32, i32) {
    %c0_i32 = arith.constant 0 : i32
    %c0_i32_0 = arith.constant 0 : i32
    %c0_i32_1 = arith.constant 0 : i32
    return %c0_i32, %c0_i32_0 : i32, i32
  }
  func.func @transform_6(%arg0: i32) -> (i32, i32) {
    %c0_i32 = arith.constant 0 : i32
    %c0_i32_0 = arith.constant 0 : i32
    %c0_i32_1 = arith.constant 0 : i32
    return %c0_i32, %c0_i32_0 : i32, i32
  }
  func.func @transform_7(%arg0: i32) -> (i32, i32) {
    %c0_i32 = arith.constant 0 : i32
    %c0_i32_0 = arith.constant 0 : i32
    %c0_i32_1 = arith.constant 0 : i32
    return %c0_i32, %c0_i32_0 : i32, i32
  }
  func.func @transform_8(%arg0: i32) -> (i32, i32, i32) {
    %c0_i32 = arith.constant 0 : i32
    %c0_i32_0 = arith.constant 0 : i32
    %c0_i32_1 = arith.constant 0 : i32
    return %arg0, %c0_i32, %c0_i32_0 : i32, i32, i32
  }
}

</mosaic_0001>

<bundles_post_ra>
// kernel: tpu_custom_call.1
= control target key start
LH: loop header
LB: loop body
LE: loop exit
PB: predicated region body
PF: predicated region fallthrough
CT: control target
= control target key end

     0   :  { %vm55_vm0 = vcmask 130048   ;;  %v802_v4 = vmov 0   ;;  %v803_v5 = vmov 2   ;;  %v804_v7 = vmov 1   ;;  %s1085_s0 = inlined_call_operand.vmem [shape: f32[2,8,16], index: 0, kind: input, shape index: {}]   ;;  %s1086_s1 = inlined_call_operand.vmem [shape: f32[8,8], index: 1, kind: input, shape index: {}]   ;;  %s1087_s2 = inlined_call_operand.vmem [shape: f32[3,16], index: 2, kind: input, shape index: {}]   ;;  %s1088_s3 = inlined_call_operand.vmem [shape: f32[2,128], index: 3, kind: input, shape index: {}]   ;;  %s1089_s4 = inlined_call_operand.vmem [shape: bf16[8,8], index: 4, kind: input, shape index: {}]   ;;  %s1090_s5 = inlined_call_operand.vmem [shape: bf16[16,128], index: 5, kind: input, shape index: {}]   ;;  %s1091_s6 = inlined_call_operand.vmem [shape: bf16[128,16], index: 6, kind: input, shape index: {}]   ;;  %s1092_s7 = inlined_call_operand.vmem [shape: bf16[8,8], index: 7, kind: input, shape index: {}]   ;;  %s1093_s8 = inlined_call_operand.hbm [shape: f32[2,8,16], index: 8, kind: output, shape index: {}]  }
   0x1   :  { %v861_v0 = vld [vmem:[%s1085_s0] sm:$0xff]  ;;  %755 = vset.pattern.permute.xlu1 %v802_v4  ;;  %757 = vset.pattern.permute.xlu0 %v803_v5 }
   0x2   :  { %v866_v1 = vld [vmem:[%s1086_s1] sm:$0xff]  ;;  %v56_v2 = vsel %vm55_vm0, %v861_v0, 0.0  ;;  %v60_v3 = vmul.f32 %v861_v0, %v861_v0 }
   0x3   :  { %57 = vadd.xlane.f32.xlu0 %v56_v2  ;;  %74 = vperm.xlu1 %755, %v866_v1  }
   0x4   :  { %v61_v6 = vsel %vm55_vm0, %v60_v3, 0.0 }
   0x7   :  { %62 = vadd.xlane.f32.xlu0 %v61_v6  ;;  %756 = vset.pattern.permute.xlu1 %v804_v7 }
   0x8   :  { %79 = vperm.xlu1 %756, %v866_v1  }
   0x9   :  { %13 = vsyncpa [#allocation3], 0  ;;  %v879_v8 = vld [vmem:[%s1085_s0 + $0x8] sm:$0xff]  ;;  %v805_v10 = vmov 0.0   ;;  %vm806_vm1 = vmmov 0   ;;  %vm93_vm2 = vcmask 1043456   ;;  %v137_v33 = vlaneseq }
   0xa   :  { %v385_v9 = vsel %vm55_vm0, %v879_v8, 0.0  ;;  %668 = vmatprep.subr.bf16.mxu0 %v805_v10  ;;  %700 = vmatprep.subr.bf16.mxu1 %v805_v10  ;;  %v389_v11 = vmul.f32 %v879_v8, %v879_v8  ;;  %v903_v31 = vld [vmem:[%s1089_s4] sm:$0xf]  ;;  %vm89_vm3 = vcmask 64512   ;;  %v939_v51 = vld [vmem:[%s1091_s6 + $0x8] sm:$0xff]   ;;  %v948_v52 = vld [vmem:[%s1091_s6 + $0x10] sm:$0xff]  }
   0xb   :  { %670 = vmatprep.mubr.msk.bf16.mxu0 %vm806_vm1, %v805_v10  ;;  %702 = vmatprep.mubr.msk.bf16.mxu1 %vm806_vm1, %v805_v10  ;;  %v913_v32 = vld [vmem:[%s1090_s5] sm:$0xff]   ;;  %v138_v34 = vshrl.u32 %v137_v33, 7  ;;  %v955_v53 = vld [vmem:[%s1091_s6 + $0x18] sm:$0xff]   ;;  %v969_v55 = vld [vmem:[%s1091_s6 + $0x28] sm:$0xff]   ;;  %v807_v58 = vmov 3  }
   0xc   :  { %v390_v12 = vsel %vm55_vm0, %v389_v11, 0.0  ;;  %v32_v36 = vld [vmem:[%s1087_s2] sm:$0x7]  ;;  %v977_v56 = vld [vmem:[%s1091_s6 + $0x30] sm:$0xff]   ;;  %v984_v57 = vld [vmem:[%s1091_s6 + $0x38] sm:$0xff]   ;;  %758 = vset.pattern.permute.xlu1 %v807_v58 }
   0xd   :  { %v139_v35 = vsub.s32 0, %v138_v34  ;;  %v144_v37 = vsub.s32 1, %v138_v34  ;;  %v932_v49 = vld [vmem:[%s1091_s6] sm:$0xff]   ;;  %v212_v11 = vsub.s32 2, %v138_v34 }
   0xe   :  { %v962_v54 = vld [vmem:[%s1091_s6 + $0x20] sm:$0xff]  }
   0xf   :  { %v920_v38 = vrot.slane %v32_v36, %v139_v35  ;;  %v925_v42 = vrot.slane %v32_v36, %v144_v37  ;;  %v33_v59 = vld [vmem:[%s1088_s3] sm:$0x3] }
  0x10   :  { %v992_v60 = vrot.slane %v33_v59, %v139_v35  ;;  %v994_v61 = vrot.slane %v33_v59, %v144_v37 }
  0x1d   :  { %86 = vperm.xlu0 %757, %v866_v1  }
  0x2c   :  { %386 = vadd.xlane.f32.xlu1 %v385_v9  ;;  %v808_v9 = vmov 4  }
  0x3c   :  { %391 = vadd.xlane.f32.xlu0 %v390_v12  ;;  %v1000_v12 = vrot.slane %v32_v36, %v212_v11 }
  0x3d   :  { %320 = vperm.xlu1 %758, %v866_v1  }
  0x41   :  { %759 = vset.pattern.permute.xlu1 %v808_v9 }
  0x82   :  { %v892_v21 = vpop.permute.xlu1 %74 }
  0x87   :  { %v895_v25 = vpop.permute.xlu1 %79 }
  0x90   :  { %v58_v13 = vpop.xlane.xlu0 %57 }
  0x91   :  { %v59_v14 = vmul.f32 0.0625, %v58_v13 }
  0x93   :  { %v65_v16 = vmul.f32 %v59_v14, %v59_v14  ;;  %v68_v22 = vsub.f32 %v861_v0, %v59_v14 }
  0x94   :  { %v63_v15 = vpop.xlane.xlu0 %62 }
  0x95   :  { %v64_v17 = vmul.f32 0.0625, %v63_v15 }
  0x97   :  { %v66_v18 = vsub.f32 %v64_v17, %v65_v16 }
  0x99   :  { %v67_v19 = vmax.f32 %v66_v18, 0.0 }
  0x9b   :  { %v69_v20 = vadd.f32 0.001, %v67_v19 }
  0x9c   :  { %v922_v39 = vpop.permute.xlu0 %86 }
  0x9d   :  { %770 = vrsqrt.f32 %v69_v20 }
  0xa7   :  { %v771_v23 = vpop.eup %770 }
  0xa8   :  { %v71_v24 = vmul.f32 %v771_v23, %v68_v22 }
  0xaa   :  { %v77_v26 = vmul.f32 %v892_v21, %v71_v24 }
  0xac   :  { %v82_v27 = vadd.f32 %v895_v25, %v77_v26 }
  0xae   :  { %v83_v28 = vmax.f32 %v82_v27, 0.0 }
  0xb0   :  { %v84_v29 = vpack.c.bf16 %v83_v28, %v83_v28 }
  0xb2   :  { %v95_v30 = vsel %vm93_vm2, %v84_v29, 0 }
  0xb3   :  { %669 = vmatpush3.bf16.msra.mxu0 %v95_v30 }
  0xb4   :  { %674 = vmatprep.subr.bf16.mxu0 %v805_v10 }
  0xb6   :  { %671 = vmatmul.mubr.msk.bf16.vlgmr.msra.gmra.mrb[0].mxu0 %vm89_vm3, %v903_v31 }
  0xb7   :  { %676 = vmatprep.mubr.msk.bf16.mxu0 %vm806_vm1, %v805_v10  ;;  %675 = vmatpush3.bf16.msra.mxu0 %v913_v32 }
  0xb8   :  { %680 = vmatprep.subr.bf16.mxu0 %v805_v10 }
  0xb9   :  { %v387_v23 = vpop.xlane.xlu1 %386 }
  0xba   :  { %v388_v24 = vmul.f32 0.0625, %v387_v23 }
  0xbc   :  { %v394_v27 = vmul.f32 %v388_v24, %v388_v24 }
  0xbd   :  { %v1006_v30 = vpop.permute.xlu1 %320 }
  0xc9   :  { %v392_v26 = vpop.xlane.xlu0 %391 }
  0xca   :  { %v393_v28 = vmul.f32 0.0625, %v392_v26 }
  0xcc   :  { %v395_v29 = vsub.f32 %v393_v28, %v394_v27 }
  0xce   :  { %v396_v33 = vmax.f32 %v395_v29, 0.0 }
  0xd0   :  { %v398_v35 = vadd.f32 0.001, %v396_v33 }
  0xd2   :  { %772 = vrsqrt.f32 %v398_v35 }
 0x189   :  { %v131_v40 = vpop.f32.mrb[0].mxu0 }
 0x18a   :  { %v132_v41 = vadd.f32 %v131_v40, %v922_v39  ;;  %v672_v43 = vpop.f32.mrb[1].mxu0 }
 0x18b   :  { %v134_v44 = vpop.f32.mrb[2].mxu0 }
 0x18c   :  { %v141_v45 = vmul.f32 %v920_v38, %v132_v41  ;;  %v673_v46 = vpop.f32.mrb[3].mxu0 }
 0x18d   :  { %v397_v46 = vsub.f32 %v879_v8, %v388_v24 }
 0x18e   :  { %v146_v47 = vadd.f32 %v925_v42, %v141_v45 }
 0x190   :  { %v147_v48 = vmax.f32 %v146_v47, 0.0  ;;  %v773_v47 = vpop.eup %772 }
 0x192   :  { %v148_v50 = vpack.c.bf16 %v147_v48, %v147_v48  ;;  %v400_v48 = vmul.f32 %v773_v47, %v397_v46 }
 0x194   :  { %677 = vmatmul.mubr.msk.bf16.vlgmr.msra.gmra.mrb[4].mxu0 %vm55_vm0, %v148_v50  ;;  %v401_v58 = vmul.f32 %v400_v48, %v892_v21  ;;  %v1019_v21 = vld [vmem:[%s1092_s7] sm:$0xf]  ;;  %s810_s7 = smov [#allocation2]  }
 0x195   :  { %681 = vmatpush3.bf16.msra.mxu0 %v932_v49  ;;  %696 = vmatprep.mubr.msk.bf16.mxu0 %vm806_vm1, %v805_v10  ;;  %s611_s30 = sshll.u32 %s810_s7, 4  ;;  %s612_s30 = int_to_ptr.vmem [resolvable:$true] %s611_s30 }
 0x196   :  { %682 = vmatprep.subr.bf16.mxu0 %v805_v10  ;;  %s778_s1 = scalar_lea.vmem %s612_s30, 256  ;;  %p783_p1 = scmp.lt.s32.totalorder %s612_s30, %s612_s30 }
 0x197   :  { %p779_p0 = scmp.ne.s32.totalorder %s612_s30, %s778_s1  ;;  %p784_p2 = scmp.lt.s32.totalorder %s778_s1, %s778_s1 }
 0x199   :  { %683 = vmatpush3.bf16.msra.mxu0 %v939_v51  ;;  %p785_p3 = por %p784_p2, %p783_p1 }
 0x19a   :  { %684 = vmatprep.subr.bf16.mxu0 %v805_v10 }
 0x19b   :  { %p786_p4 = pnand %p785_p3, %p779_p0 }
 0x19d   :  { %685 = vmatpush3.bf16.msra.mxu0 %v948_v52 }
 0x19e   :  { %686 = vmatprep.subr.bf16.mxu0 %v805_v10 }
 0x1a1   :  { %687 = vmatpush3.bf16.msra.mxu0 %v955_v53 }
 0x1a2   :  { %688 = vmatprep.subr.bf16.mxu0 %v805_v10 }
 0x1a5   :  { %689 = vmatpush3.bf16.msra.mxu0 %v962_v54 }
 0x1a6   :  { %690 = vmatprep.subr.bf16.mxu0 %v805_v10 }
 0x1a9   :  { %691 = vmatpush3.bf16.msra.mxu0 %v969_v55 }
 0x1aa   :  { %692 = vmatprep.subr.bf16.mxu0 %v805_v10 }
 0x1ad   :  { %693 = vmatpush3.bf16.msra.mxu0 %v977_v56 }
 0x1ae   :  { %694 = vmatprep.subr.bf16.mxu0 %v805_v10 }
 0x1b1   :  { %695 = vmatpush3.bf16.msra.mxu0 %v984_v57 }
 0x1b2   :  { %738 = vmatprep.subr.bf16.mxu0 %v805_v10 }
 0x267   :  { %v192_v62 = vpop.f32.mrb[4].mxu0 }
 0x268   :  { %v202_v63 = vmul.f32 %v992_v60, %v192_v62  ;;  %v678_v2 = vpop.f32.mrb[5].mxu0 }
 0x269   :  { %v195_v3 = vpop.f32.mrb[6].mxu0 }
 0x26a   :  { %v207_v4 = vadd.f32 %v994_v61, %v202_v63  ;;  %v679_v5 = vpop.f32.mrb[7].mxu0  ;;  %v402_v3 = vadd.f32 %v401_v58, %v895_v25 }
 0x26c   :  { %v208_v6 = vmax.f32 %v207_v4, 0.0 }
 0x26e   :  { %v209_v7 = vpack.c.bf16 %v208_v6, %v208_v6  ;;  %v403_v6 = vmax.f32 %v402_v3, 0.0 }
 0x270   :  { %697 = vmatmul.mubr.bf16.vlgmr.msra.gmra.mrb[8].mxu0 %v209_v7  ;;  %v404_v11 = vpack.c.bf16 %v403_v6, %v403_v6 }
 0x271   :  { %740 = vmatprep.mubr.msk.bf16.mxu0 %vm806_vm1, %v805_v10 }
 0x272   :  { %v406_v25 = vsel %vm93_vm2, %v404_v11, 0 }
 0x343   :  { %v296_v13 = vpop.f32.mrb[8].mxu0 }
 0x344   :  { %v297_v14 = vadd.f32 %v296_v13, %v1000_v12  ;;  %v698_v15 = vpop.f32.mrb[9].mxu0 }
 0x345   :  { %v299_v16 = vpop.f32.mrb[10].mxu0 }
 0x346   :  { %v302_v17 = vadd.f32 %v297_v14, %v132_v41  ;;  %v699_v18 = vpop.f32.mrb[11].mxu0 }
 0x348   :  { %v303_v19 = vsel %vm55_vm0, %v302_v17, 0.0  ;;  %v307_v20 = vmul.f32 %v302_v17, %v302_v17 }
 0x349   :  { %304 = vadd.xlane.f32.xlu1 %v303_v19 }
 0x34a   :  { %v308_v22 = vsel %vm55_vm0, %v307_v20, 0.0 }
 0x34d   :  { %309 = vadd.xlane.f32.xlu1 %v308_v22 }
 0x35e   :  { %325 = vperm.xlu1 %759, %v866_v1  }
 0x3d6   :  { %v305_v34 = vpop.xlane.xlu1 %304 }
 0x3d7   :  { %v306_v36 = vmul.f32 0.0625, %v305_v34 }
 0x3d9   :  { %v312_v40 = vmul.f32 %v306_v36, %v306_v36  ;;  %v315_v50 = vsub.f32 %v302_v17, %v306_v36 }
 0x3da   :  { %v310_v37 = vpop.xlane.xlu1 %309 }
 0x3db   :  { %v311_v41 = vmul.f32 0.0625, %v310_v37 }
 0x3dd   :  { %v313_v43 = vsub.f32 %v311_v41, %v312_v40 }
 0x3de   :  { %v1010_v63 = vpop.permute.xlu1 %325 }
 0x3df   :  { %v314_v44 = vmax.f32 %v313_v43, 0.0 }
 0x3e1   :  { %v316_v45 = vadd.f32 0.001, %v314_v44 }
 0x3e3   :  { %774 = vrsqrt.f32 %v316_v45 }
 0x3ed   :  { %v775_v59 = vpop.eup %774 }
 0x3ee   :  { %v318_v62 = vmul.f32 %v775_v59, %v315_v50 }
 0x3f0   :  { %v323_v2 = vmul.f32 %v1006_v30, %v318_v62 }
 0x3f2   :  { %v328_v4 = vadd.f32 %v1010_v63, %v323_v2 }
 0x3f4   :  { %v329_v5 = vmax.f32 %v328_v4, 0.0 }
 0x3f6   :  { %v330_v7 = vpack.c.bf16 %v329_v5, %v329_v5 }
 0x3f8   :  { %v339_v9 = vsel %vm93_vm2, %v330_v7, 0 }
 0x3f9   :  { %701 = vmatpush3.bf16.msra.mxu1 %v339_v9 }
 0x3fa   :  { %706 = vmatprep.subr.bf16.mxu1 %v805_v10 }
 0x3fc   :  { %703 = vmatmul.mubr.msk.bf16.vlgmr.msra.gmra.mrb[0].mxu1 %vm89_vm3, %v1019_v21 }
 0x3fd   :  { %707 = vmatpush3.bf16.msra.mxu1 %v406_v25  ;;  %708 = vmatprep.mubr.msk.bf16.mxu1 %vm806_vm1, %v805_v10 }
 0x3fe   :  { %712 = vmatprep.subr.bf16.mxu1 %v805_v10 }
 0x404   :  { %709 = vmatmul.mubr.msk.bf16.vlgmr.msra.gmra.mrb[4].mxu1 %vm89_vm3, %v903_v31 }
 0x405   :  { %713 = vmatpush3.bf16.msra.mxu1 %v913_v32  ;;  %714 = vmatprep.mubr.msk.bf16.mxu1 %vm806_vm1, %v805_v10 }
 0x406   :  { %718 = vmatprep.subr.bf16.mxu1 %v805_v10 }
 0x4cf   :  { %v1034_v13 = vpop.f32.mrb[0].mxu1 }
 0x4d0   :  { %v704_v14 = vpop.f32.mrb[1].mxu1 }
 0x4d1   :  { %v378_v15 = vpop.f32.mrb[2].mxu1 }
 0x4d2   :  { %v705_v16 = vpop.f32.mrb[3].mxu1 }
 0x4d7   :  { %v442_v17 = vpop.f32.mrb[4].mxu1 }
 0x4d8   :  { %v443_v18 = vadd.f32 %v442_v17, %v922_v39  ;;  %v710_v19 = vpop.f32.mrb[5].mxu1 }
 0x4d9   :  { %v445_v20 = vpop.f32.mrb[6].mxu1 }
 0x4da   :  { %v448_v22 = vmul.f32 %v443_v18, %v920_v38  ;;  %v711_v31 = vpop.f32.mrb[7].mxu1 }
 0x4dc   :  { %v449_v32 = vadd.f32 %v448_v22, %v925_v42 }
 0x4de   :  { %v450_v23 = vmax.f32 %v449_v32, 0.0 }
 0x4e0   :  { %v451_v24 = vpack.c.bf16 %v450_v23, %v450_v23 }
 0x4e2   :  { %715 = vmatmul.mubr.msk.bf16.vlgmr.msra.gmra.mrb[8].mxu1 %vm55_vm0, %v451_v24 }
 0x4e3   :  { %719 = vmatpush3.bf16.msra.mxu1 %v932_v49  ;;  %734 = vmatprep.mubr.msk.bf16.mxu1 %vm806_vm1, %v805_v10 }
 0x4e4   :  { %720 = vmatprep.subr.bf16.mxu1 %v805_v10 }
 0x4e7   :  { %721 = vmatpush3.bf16.msra.mxu1 %v939_v51 }
 0x4e8   :  { %722 = vmatprep.subr.bf16.mxu1 %v805_v10 }
 0x4eb   :  { %723 = vmatpush3.bf16.msra.mxu1 %v948_v52 }
 0x4ec   :  { %724 = vmatprep.subr.bf16.mxu1 %v805_v10 }
 0x4ef   :  { %725 = vmatpush3.bf16.msra.mxu1 %v955_v53 }
 0x4f0   :  { %726 = vmatprep.subr.bf16.mxu1 %v805_v10 }
 0x4f3   :  { %727 = vmatpush3.bf16.msra.mxu1 %v962_v54 }
 0x4f4   :  { %728 = vmatprep.subr.bf16.mxu1 %v805_v10 }
 0x4f7   :  { %729 = vmatpush3.bf16.msra.mxu1 %v969_v55  ;;  %v809_v55 = vmov 5  }
 0x4f8   :  { %730 = vmatprep.subr.bf16.mxu1 %v805_v10  ;;  %760 = vset.pattern.permute.xlu0 %v809_v55 }
 0x4fb   :  { %731 = vmatpush3.bf16.msra.mxu1 %v977_v56 }
 0x4fc   :  { %732 = vmatprep.subr.bf16.mxu1 %v805_v10 }
 0x4ff   :  { %733 = vmatpush3.bf16.msra.mxu1 %v984_v57 }
 0x5b5   :  { %v489_v38 = vpop.f32.mrb[8].mxu1 }
 0x5b6   :  { %v495_v39 = vmul.f32 %v489_v38, %v992_v60  ;;  %v716_v42 = vpop.f32.mrb[9].mxu1 }
 0x5b7   :  { %v492_v49 = vpop.f32.mrb[10].mxu1 }
 0x5b8   :  { %v496_v51 = vadd.f32 %v495_v39, %v994_v61  ;;  %v717_v52 = vpop.f32.mrb[11].mxu1 }
 0x5ba   :  { %v497_v53 = vmax.f32 %v496_v51, 0.0 }
 0x5bc   :  { %v498_v54 = vpack.c.bf16 %v497_v53, %v497_v53 }
 0x5be   :  { %735 = vmatmul.mubr.bf16.vlgmr.msra.gmra.mrb[12].mxu1 %v498_v54 }
 0x691   :  { %v533_v26 = vpop.f32.mrb[12].mxu1 }
 0x692   :  { %v534_v56 = vadd.f32 %v533_v26, %v1000_v12  ;;  %v736_v27 = vpop.f32.mrb[13].mxu1 }
 0x693   :  { %v536_v10 = vpop.f32.mrb[14].mxu1 }
 0x694   :  { %v539_v28 = vadd.f32 %v534_v56, %v443_v18  ;;  %v737_v57 = vpop.f32.mrb[15].mxu1 }
 0x696   :  { %v540_v29 = vsel %vm55_vm0, %v539_v28, 0.0  ;;  %v544_v60 = vmul.f32 %v539_v28, %v539_v28 }
 0x697   :  { %541 = vadd.xlane.f32.xlu1 %v540_v29 }
 0x698   :  { %v545_v33 = vsel %vm55_vm0, %v544_v60, 0.0 }
 0x699   :  { %546 = vadd.xlane.f32.xlu0 %v545_v33 }
 0x6af   :  { %332 = vperm.xlu0 %760, %v866_v1  }
 0x724   :  { %v542_v61 = vpop.xlane.xlu1 %541 }
 0x725   :  { %v543_v34 = vmul.f32 0.0625, %v542_v61 }
 0x726   :  { %v547_v35 = vpop.xlane.xlu0 %546 }
 0x727   :  { %v549_v36 = vmul.f32 %v543_v34, %v543_v34  ;;  %v548_v37 = vmul.f32 0.0625, %v547_v35  ;;  %v552_v46 = vsub.f32 %v539_v28, %v543_v34 }
 0x729   :  { %v550_v40 = vsub.f32 %v548_v37, %v549_v36 }
 0x72b   :  { %v551_v12 = vmax.f32 %v550_v40, 0.0 }
 0x72d   :  { %v553_v41 = vadd.f32 0.001, %v551_v12 }
 0x72e   :  { %v333_v43 = vpop.permute.xlu0 %332 }
 0x72f   :  { %776 = vrsqrt.f32 %v553_v41  ;;  %v376_v44 = vadd.f32 %v1034_v13, %v333_v43 }
 0x731   :  { %v381_v45 = vadd.f32 %v376_v44, %v861_v0 }
 0x733   :  { %382 = vst.msk [vmem:[#allocation2] sm:$0xff] %vm55_vm0, %v381_v45 }
 0x739   :  { %v777_v47 = vpop.eup %776 }
 0x73a   :  { %v555_v48 = vmul.f32 %v777_v47, %v552_v46 }
 0x73c   :  { %v556_v1 = vmul.f32 %v555_v48, %v1006_v30 }
 0x73e   :  { %v557_v50 = vadd.f32 %v556_v1, %v1010_v63 }
 0x740   :  { %v558_v58 = vmax.f32 %v557_v50, 0.0 }
 0x742   :  { %v559_v59 = vpack.c.bf16 %v558_v58, %v558_v58 }
 0x744   :  { %v561_v62 = vsel %vm93_vm2, %v559_v59, 0 }
 0x745   :  { %739 = vmatpush3.bf16.msra.mxu0 %v561_v62 }
 0x748   :  { %741 = vmatmul.mubr.msk.bf16.vlgmr.msra.gmra.mrb[12].mxu0 %vm89_vm3, %v1019_v21 }
 0x81b   :  { %v597_v0 = vpop.f32.mrb[12].mxu0 }
 0x81c   :  { %v598_v2 = vadd.f32 %v597_v0, %v333_v43  ;;  %v742_v3 = vpop.f32.mrb[13].mxu0 }
 0x81d   :  { %v600_v4 = vpop.f32.mrb[14].mxu0 }
 0x81e   :  { %v603_v5 = vadd.f32 %v879_v8, %v598_v2  ;;  %v743_v30 = vpop.f32.mrb[15].mxu0 }
 0x820   :  { %605 = vst.msk [vmem:[#allocation2 + $0x8] sm:$0xff] %vm55_vm0, %v603_v5 }
 0x821   :  { %789 = shalt.err (!%p786_p4)
}
 0x822   :  { %s790_s10 = scalar_lea.hbm %s1093_s8, 256 }
 0x823   :  { %p791_p5 = scmp.ne.s32.totalorder %s1093_s8, %s790_s10  ;;  %p794_p6 = scmp.lt.u32.totalorder %s790_s10, %s1093_s8 }
 0x825   :  { %p796_p7 = pnand %p794_p6, %p791_p5 }
 0x827   :  { %799 = shalt.err (!%p796_p7)
}
 0x828   :  { %s811_s5 = smov 128   ;;  %s812_s2 = smov 8  }
 0x829   :  { %617 = dma.vmem_to_hbm [thread:$0]  %s612_s30, 256, %s1093_s8, [#allocation3], %s811_s5, %s811_s5, %s812_s2  }
 0x82a   :  { %800 = dma.done.wait [#allocation3], 256  }
 0x82b   :  { %801 = vsyncadd [#allocation3], 4294967040 }
 0x82c   :  { %621 = vsyncpa [#allocation3], 1 }

</bundles_post_ra>
